<compile_context>
chip_gen: v5e
topology: v5e:2x2
jax: 0.10.0
libtpu: 0.0.40
codegen_flags: <defaults>
</compile_context>

<pallas_src>
import functools

import jax
import jax.numpy as jnp
from jax.experimental import pallas as pl
from jax.experimental.pallas import tpu as pltpu


def _make_shift_kernel(flat_shift: int):
    """Kernel over (P, H*W) blocks: flat rotate + mask multiply, one store."""

    def kernel(x_ref, mask_ref, o_ref):
        data = x_ref[...]                               # (P, H*W)
        if flat_shift != 0:
            # XLU lane rotation; wrapped / out-of-range sources are zeroed by
            # the mask multiply below.
            data = pltpu.roll(data, shift=flat_shift, axis=1)
        # mask is 0/1 in x.dtype -> a single dtype-matched vmul per vreg.
        o_ref[...] = data * mask_ref[...]

    return kernel


def shift2d_reference(x: jax.Array, shift) -> jax.Array:
    """Pure-JAX reference (mirrors the torch ZeroPad2d + Crop2d sequence)."""
    vert, horz = shift
    y_a, y_b = (abs(vert), 0)
    x_a, x_b = (abs(horz), 0)
    if vert < 0:
        y_a, y_b = y_b, y_a
    if horz < 0:
        x_a, x_b = x_b, x_a
    padded = jnp.pad(x, ((0, 0), (0, 0), (y_a, y_b), (x_a, x_b)))
    Hp, Wp = padded.shape[-2], padded.shape[-1]
    # Crop2d((x_b, x_a, y_b, y_a)): left=x_b, right=x_a, top=y_b, bottom=y_a
    return padded[:, :, y_b:Hp - y_a, x_b:Wp - x_a]


@functools.partial(jax.jit, static_argnames=("shift",))
def shift2d(x: jax.Array, shift) -> jax.Array:
    """Pallas implementation of Shift2d.forward.  x: (N, C, H, W)."""
    vert, horz = int(shift[0]), int(shift[1])
    N, C, H, W = x.shape

    # Degenerate cases: no kernel launch, no HBM traffic.
    if vert == 0 and horz == 0:
        return x
    if abs(vert) >= H or abs(horz) >= W:
        return jnp.zeros_like(x)

    NC, HW = N * C, H * W
    x_flat = x.reshape(NC, HW)                          # lane-dense layout

    itemsize = jnp.dtype(x.dtype).itemsize
    sublane = {4: 8, 2: 16, 1: 32}.get(itemsize, 8)
    plane_bytes = HW * itemsize
    mask_bytes = HW * itemsize

    # --- chip-aware VMEM budget ------------------------------------------
    try:
        vmem_cap = int(pltpu.get_tpu_info().vmem_capacity_bytes)
    except Exception:
        vmem_cap = 64 << 20                             # conservative (v7x)
    vmem_budget = (vmem_cap * 3) // 4                   # headroom for XLA fusions

    # Pathological plane size: even the minimum legal block (sublane planes,
    # double-buffered in+out) would not fit the VMEM budget.
    min_footprint = 4 * min(sublane, NC) * plane_bytes + mask_bytes + (2 << 20)
    if min_footprint > vmem_budget:
        # TODO(synk): tile the H*W axis (2-D grid with an explicit roll seam)
        # for planes too large to double-buffer in VMEM; fall back to XLA here.
        return shift2d_reference(x, (vert, horz))

    # --- block sizing: ~8 MiB per buffer, sublane-aligned plane count ------
    target_block_bytes = 8 << 20
    while (target_block_bytes > (1 << 20)
           and 4 * target_block_bytes + mask_bytes + (2 << 20) > vmem_budget):
        target_block_bytes //= 2

    p = max(1, target_block_bytes // plane_bytes)
    if p >= NC:
        P = NC                                          # full extent: always legal
    else:
        P = max(sublane, (p // sublane) * sublane)      # multiple of sublane tile

    # v7x has two TensorCores: make sure the "parallel" axis has >= 2 steps
    # whenever the problem is large enough to split (no effect on v5e/v6e).
    if pl.cdiv(NC, P) < 2 and NC >= 2 * sublane:
        P = max(sublane, ((NC // 2) // sublane) * sublane)

    grid = (pl.cdiv(NC, P),)
    block_bytes = P * plane_bytes

    # in + out, each double-buffered, plus the (tiny) resident mask + margin,
    # clamped to the chip's budget (64 MiB VMEM on v7x, 128 MiB on v5e/v6e).
    vmem_limit = int(min(vmem_budget,
                         max(32 << 20, 4 * block_bytes + mask_bytes + (2 << 20))))

    # --- validity mask over one flattened plane: 1 where the source index
    #     (y - vert, x - horz) is inside the image, else 0 -------------------
    rows = jnp.arange(H, dtype=jnp.int32)[:, None]
    cols = jnp.arange(W, dtype=jnp.int32)[None, :]
    valid = ((rows >= vert) & (rows < H + vert)
             & (cols >= horz) & (cols < W + horz))
    mask = valid.reshape(1, HW).astype(x.dtype)         # dtype-matched multiply

    # Flat rotate amount, normalized to [0, HW).
    flat_shift = (vert * W + horz) % HW

    out_flat = pl.pallas_call(
        _make_shift_kernel(flat_shift),
        out_shape=jax.ShapeDtypeStruct((NC, HW), x.dtype),
        grid=grid,
        in_specs=[
            pl.BlockSpec((P, HW), lambda i: (i, 0)),    # P image planes / step
            pl.BlockSpec((1, HW), lambda i: (0, 0)),    # mask: resident, reused
        ],
        out_specs=pl.BlockSpec((P, HW), lambda i: (i, 0)),
        compiler_params=pltpu.CompilerParams(
            dimension_semantics=("parallel",),
            vmem_limit_bytes=vmem_limit,
        ),
        cost_estimate=pl.CostEstimate(
            flops=0,
            transcendentals=0,
            bytes_accessed=int(2 * NC * HW * itemsize + mask_bytes),
        ),
    )(x_flat, mask)

    return out_flat.reshape(N, C, H, W)


if __name__ == "__main__":
    key = jax.random.PRNGKey(0)
    N, C, H, W = 2, 4, 16, 16
    x = jax.random.normal(key, (N, C, H, W), dtype=jnp.float32)

    test_shifts = [(3, -2), (-1, 4), (5, 0), (0, -3), (0, 0), (H, 2)]
    for shift in test_shifts:
        out = shift2d(x, shift)
        jax.block_until_ready(out)
        ref = shift2d_reference(x, shift)
        assert out.shape == ref.shape == (N, C, H, W)
        assert jnp.allclose(out, ref), f"Pallas Shift2d mismatch for shift={shift}"

    print("KERNEL_OK")
</pallas_src>

<mosaic_0001>
module attributes {stable_mosaic.version = 11 : i64} {
  func.func @kernel(%arg0: i32, %arg1: memref<8x256xf32, #tpu.memory_space<vmem>>, %arg2: memref<1x256xf32, #tpu.memory_space<vmem>>, %arg3: memref<8x256xf32, #tpu.memory_space<vmem>>) attributes {dimension_semantics = [#tpu.dimension_semantics<parallel>], iteration_bounds = array<i64: 1>, scalar_prefetch = 0 : i64, scratch_operands = 0 : i64, tpu.core_type = #tpu.core_type<tc>, window_params = [{transform_indices = @transform_0, window_bounds = array<i64: 8, 256>}, {pipeline_mode = #tpu.pipeline_mode<synchronous>, transform_indices = @transform_1, window_bounds = array<i64: 1, 256>}, {transform_indices = @transform_2, window_bounds = array<i64: 8, 256>}]} {
    %c0 = arith.constant 0 : index
    %c0_0 = arith.constant 0 : index
    %0 = vector.load %arg1[%c0, %c0_0] : memref<8x256xf32, #tpu.memory_space<vmem>>, vector<8x256xf32>
    %c46_i32 = arith.constant 46 : i32
    %1 = tpu.dynamic_rotate %0 by %c46_i32 dim 1 : vector<8x256xf32>, i32 -> vector<8x256xf32>
    %c0_1 = arith.constant 0 : index
    %c0_2 = arith.constant 0 : index
    %2 = vector.load %arg2[%c0_1, %c0_2] : memref<1x256xf32, #tpu.memory_space<vmem>>, vector<1x256xf32>
    %3 = vector.broadcast %2 : vector<1x256xf32> to vector<8x256xf32>
    %4 = arith.mulf %1, %3 : vector<8x256xf32>
    %c0_3 = arith.constant 0 : index
    %c0_4 = arith.constant 0 : index
    %5 = vector.load %arg3[%c0_3, %c0_4] : memref<8x256xf32, #tpu.memory_space<vmem>>, vector<8x256xf32>
    tpu.vector_store %arg3[%c0_3, %c0_4], %4 {strides = array<i32>} : memref<8x256xf32, #tpu.memory_space<vmem>>, vector<8x256xf32>,
    return
  }
  func.func @transform_0(%arg0: i32) -> (i32, i32) {
    %c0_i32 = arith.constant 0 : i32
    %c0_i32_0 = arith.constant 0 : i32
    return %arg0, %c0_i32 : i32, i32
  }
  func.func @transform_1(%arg0: i32) -> (i32, i32) {
    %c0_i32 = arith.constant 0 : i32
    %c0_i32_0 = arith.constant 0 : i32
    %c0_i32_1 = arith.constant 0 : i32
    return %c0_i32, %c0_i32_0 : i32, i32
  }
  func.func @transform_2(%arg0: i32) -> (i32, i32) {
    %c0_i32 = arith.constant 0 : i32
    %c0_i32_0 = arith.constant 0 : i32
    return %arg0, %c0_i32 : i32, i32
  }
}

</mosaic_0001>

<bundles_post_ra>
// kernel: shift2d.1
= control target key start
LH: loop header
LB: loop body
LE: loop exit
PB: predicated region body
PF: predicated region fallthrough
CT: control target
= control target key end

     0   :  { %s37_s11 = smov 46   ;;  %v17_v2 = vlaneseq  ;;  %s68_s0 = inlined_call_operand.vmem [shape: f32[8,256], index: 0, kind: input, shape index: {}]   ;;  %s69_s1 = inlined_call_operand.vmem [shape: f32[1,256], index: 1, kind: input, shape index: {}]   ;;  %s70_s2 = inlined_call_operand.vmem [shape: f32[8,256], index: 2, kind: output, shape index: {}]  }
   0x1   :  { %v11_v0 = vld [vmem:[%s68_s0] sm:$0xff]  ;;  %v12_v1 = vld [vmem:[%s68_s0 + $0x8] sm:$0xff] }
   0x2   :  { %13 = vrot.lane.b32.xlu0 %v11_v0, %s37_s11  ;;  %v18_v4 = vand.u32 127, %v17_v2  ;;  %v22_v5 = vld [vmem:[%s69_s1] sm:$0x3] }
   0x3   :  { %v24_v6 = vperm.slane %v22_v5, 0  ;;  %v25_v7 = vperm.slane %v22_v5, 1 }
   0x4   :  { %vm19_vm0 = vcmp.lt.s32.totalorder %v18_v4, 46 }
   0xa   :  { %15 = vrot.lane.b32.xlu0 %v12_v1, %s37_s11 }
  0x74   :  { %v14_v3 = vpop.permute.xlu0 %13 }
  0x7c   :  { %v16_v8 = vpop.permute.xlu0 %15 }
  0x7d   :  { %v20_v9 = vsel %vm19_vm0, %v14_v3, %v16_v8  ;;  %v21_v10 = vsel %vm19_vm0, %v16_v8, %v14_v3 }
  0x7e   :  { %v28_v11 = vmul.f32 %v24_v6, %v21_v10  ;;  %v29_v12 = vmul.f32 %v25_v7, %v20_v9 }
  0x80   :  { %30 = vst [vmem:[%s70_s2] sm:$0xff] %v28_v11 }
  0x81   :  { %31 = vst [vmem:[%s70_s2 + $0x8] sm:$0xff] %v29_v12 }

</bundles_post_ra>
